<compile_context>
chip_gen: v5e
topology: v5e:2x2
jax: 0.10.0
libtpu: 0.0.40
codegen_flags: <defaults>
</compile_context>

<pallas_src>
import math
import functools

import jax
import jax.numpy as jnp
from jax.experimental import pallas as pl
from jax.experimental.pallas import tpu as pltpu


# ---------------------------------------------------------------------------
# Pallas kernel: one (batch, token-tile) step of
#     out = (patches @ W + b) * sqrt(D) + PE
# ---------------------------------------------------------------------------
def _embed_posenc_kernel(x_ref, w_ref, b_ref, pe_ref, o_ref, *, scale):
    # x_ref : (1, W, TS)  bf16  patch windows, W in sublanes, tokens in lanes
    # w_ref : (W, Dp)     bf16  conv1d weight (kernel, padded out_channels)
    # b_ref : (1, Dp)     f32   conv1d bias (padded)
    # pe_ref: (TS, Dp)    f32   positional-encoding tile (padded)
    # o_ref : (1, TS, Dp) f32
    xw = x_ref[0]                                        # (W, TS)
    emb = jax.lax.dot_general(                           # (TS, Dp), f32 acc on MXU
        xw, w_ref[...],
        dimension_numbers=(((0,), (0,)), ((), ())),
        preferred_element_type=jnp.float32)
    emb = (emb + b_ref[...]) * scale + pe_ref[...]       # f32 elementwise (VPU)
    o_ref[0] = emb.astype(o_ref.dtype)


def kernel_transformer_pretrain_fwd(x, conv_w, conv_b, pe, *, window_size,
                                    d_model, token_tile=512):
    """Forward of KernelTransformerPretrain (up to positional encoding).

    x      : (B, L, 1) float32 raw signal, batch_first
    conv_w : (d_model, 1, window_size)   Conv1d weight (PyTorch layout)
    conv_b : (d_model,)                  Conv1d bias
    pe     : (max_seq_len, d_model)      precomputed positional encoding
    returns: (B, L // window_size, d_model) float32
    """
    B, L, C = x.shape
    assert C == 1
    # Conv1d(stride=window_size) silently drops the trailing remainder.
    S = L // window_size
    assert S > 0

    # Lane-dense output width (multiple of 128).
    Dp = ((d_model + 127) // 128) * 128

    # Token (row) tiling: big tiles when S is large, full-S block otherwise.
    if S <= token_tile:
        TS, S_pad = S, S
    else:
        TS = token_tile
        S_pad = ((S + TS - 1) // TS) * TS
    num_s = S_pad // TS

    # ---- wrapper glue (plain JAX): patch extraction, layout, padding -------
    patches = x[:, : S * window_size, 0].reshape(B, S, window_size)
    patches_t = jnp.transpose(patches, (0, 2, 1))            # (B, W, S)
    if S_pad != S:
        patches_t = jnp.pad(patches_t, ((0, 0), (0, 0), (0, S_pad - S)))
    patches_t = patches_t.astype(jnp.bfloat16)                # stream as bf16

    w_mat = jnp.transpose(conv_w[:, 0, :], (1, 0))            # (W, D)
    if Dp != d_model:
        w_mat = jnp.pad(w_mat, ((0, 0), (0, Dp - d_model)))
    w_mat = w_mat.astype(jnp.bfloat16)

    bias = conv_b
    if Dp != d_model:
        bias = jnp.pad(bias, (0, Dp - d_model))
    bias = bias.reshape(1, Dp).astype(jnp.float32)

    pe_s = pe[:S, :].astype(jnp.float32)
    pe_s = jnp.pad(pe_s, ((0, S_pad - S), (0, Dp - d_model)))

    scale = math.sqrt(d_model)
    kernel = functools.partial(_embed_posenc_kernel, scale=scale)

    # Advisory cost (mem-bound streaming kernel, output traffic dominates).
    cost = pl.CostEstimate(
        flops=2 * B * S_pad * window_size * Dp,
        transcendentals=0,
        bytes_accessed=(B * S_pad * window_size * 2      # bf16 patches
                        + window_size * Dp * 2            # bf16 weight
                        + S_pad * Dp * 4                  # f32 PE (read once/tile)
                        + B * S_pad * Dp * 4),            # f32 output
    )

    # Rough double-buffered per-step VMEM footprint with headroom; valid on
    # v5e/v6e (128 MiB VMEM) and v7x (64 MiB).
    step_bytes = (window_size * TS * 2 + TS * Dp * 4 + TS * Dp * 4)
    vmem_limit = int(min(96 * 1024 * 1024,
                         max(32 * 1024 * 1024, 4 * step_bytes)))

    out = pl.pallas_call(
        kernel,
        out_shape=jax.ShapeDtypeStruct((B, S_pad, Dp), jnp.float32),
        grid_spec=pltpu.PrefetchScalarGridSpec(
            num_scalar_prefetch=0,
            # batch innermost -> PE / weight / bias block indices are constant
            # across consecutive steps, so their DMAs are skipped.
            grid=(num_s, B),
            in_specs=[
                pl.BlockSpec((1, window_size, TS), lambda s, b: (b, 0, s)),
                pl.BlockSpec((window_size, Dp), lambda s, b: (0, 0)),
                pl.BlockSpec((1, Dp), lambda s, b: (0, 0)),
                pl.BlockSpec((TS, Dp), lambda s, b: (s, 0)),
            ],
            out_specs=pl.BlockSpec((1, TS, Dp), lambda s, b: (b, s, 0)),
        ),
        compiler_params=pltpu.CompilerParams(
            dimension_semantics=("parallel", "parallel"),
            vmem_limit_bytes=vmem_limit,
        ),
        cost_estimate=cost,
    )(patches_t, w_mat, bias, pe_s)

    return out[:, :S, :d_model]


# ---------------------------------------------------------------------------
# Parameter / buffer construction (deterministic, in-script)
# ---------------------------------------------------------------------------
def make_positional_encoding(max_seq_len, embed_dim):
    position = jnp.arange(max_seq_len, dtype=jnp.float32)[:, None]
    div_term = jnp.exp(jnp.arange(0, embed_dim, 2, dtype=jnp.float32)
                       * (-math.log(10000.0) / embed_dim))
    pe = jnp.zeros((max_seq_len, embed_dim), jnp.float32)
    pe = pe.at[:, 0::2].set(jnp.sin(position * div_term))
    # [: embed_dim // 2] guards the odd-embed_dim case.
    pe = pe.at[:, 1::2].set(jnp.cos(position * div_term)[:, : embed_dim // 2])
    return pe


def init_conv1d_params(key, d_model, window_size):
    # PyTorch Conv1d default init: U(-1/sqrt(fan_in), 1/sqrt(fan_in)),
    # fan_in = in_channels * kernel_size = window_size.
    kw, kb = jax.random.split(key)
    bound = 1.0 / math.sqrt(window_size)
    w = jax.random.uniform(kw, (d_model, 1, window_size), jnp.float32, -bound, bound)
    b = jax.random.uniform(kb, (d_model,), jnp.float32, -bound, bound)
    return w, b


# ---------------------------------------------------------------------------
if __name__ == "__main__":
    # Small shapes consistent with the module's forward.
    B = 2            # batch
    window_size = 8  # SignalEmbedding conv kernel == stride
    S = 8            # number of tokens after embedding
    L = S * window_size
    d_model = 32
    max_seq_len = 64

    key = jax.random.PRNGKey(0)
    k_x, k_p = jax.random.split(key)

    x = jax.random.normal(k_x, (B, L, 1), jnp.float32)          # raw signal
    conv_w, conv_b = init_conv1d_params(k_p, d_model, window_size)
    pe = make_positional_encoding(max_seq_len, d_model)

    fwd = jax.jit(functools.partial(
        kernel_transformer_pretrain_fwd, window_size=window_size,
        d_model=d_model))
    out = fwd(x, conv_w, conv_b, pe)
    out = jax.block_until_ready(out)

    # Pure-JAX reference with the same bf16-streamed input precision.
    patches = x[:, : S * window_size, 0].reshape(B, S, window_size)
    w_mat = jnp.transpose(conv_w[:, 0, :], (1, 0))
    p_q = patches.astype(jnp.bfloat16).astype(jnp.float32)
    w_q = w_mat.astype(jnp.bfloat16).astype(jnp.float32)
    ref = jnp.einsum("bsw,wd->bsd", p_q, w_q)
    ref = (ref + conv_b[None, None, :]) * math.sqrt(d_model) + pe[None, :S, :]

    assert out.shape == (B, S, d_model)
    assert jnp.allclose(out, ref, atol=1e-4, rtol=1e-4)

    print("KERNEL_OK")
</pallas_src>

<mosaic_0001>
module attributes {stable_mosaic.version = 11 : i64} {
  func.func @_embed_posenc_kernel(%arg0: i32, %arg1: i32, %arg2: memref<1x8x8xbf16, #tpu.memory_space<vmem>>, %arg3: memref<8x128xbf16, #tpu.memory_space<vmem>>, %arg4: memref<1x128xf32, #tpu.memory_space<vmem>>, %arg5: memref<8x128xf32, #tpu.memory_space<vmem>>, %arg6: memref<1x8x128xf32, #tpu.memory_space<vmem>>) attributes {dimension_semantics = [#tpu.dimension_semantics<parallel>, #tpu.dimension_semantics<parallel>], iteration_bounds = array<i64: 1, 2>, scalar_prefetch = 0 : i64, scratch_operands = 0 : i64, tpu.core_type = #tpu.core_type<tc>, window_params = [{transform_indices = @transform_0, window_bounds = array<i64: 1, 8, 8>}, {pipeline_mode = #tpu.pipeline_mode<synchronous>, transform_indices = @transform_1, window_bounds = array<i64: 8, 128>}, {pipeline_mode = #tpu.pipeline_mode<synchronous>, transform_indices = @transform_2, window_bounds = array<i64: 1, 128>}, {transform_indices = @transform_3, window_bounds = array<i64: 8, 128>}, {transform_indices = @transform_4, window_bounds = array<i64: 1, 8, 128>}]} {
    %c0 = arith.constant 0 : index
    %c0_0 = arith.constant 0 : index
    %c0_1 = arith.constant 0 : index
    %0 = vector.load %arg2[%c0, %c0_0, %c0_1] : memref<1x8x8xbf16, #tpu.memory_space<vmem>>, vector<1x8x8xbf16>
    %1 = vector.shape_cast %0 : vector<1x8x8xbf16> to vector<8x8xbf16>
    %c0_2 = arith.constant 0 : index
    %c0_3 = arith.constant 0 : index
    %2 = vector.load %arg3[%c0_2, %c0_3] : memref<8x128xbf16, #tpu.memory_space<vmem>>, vector<8x128xbf16>
    %cst = arith.constant dense<0.000000e+00> : vector<8x128xf32>
    %3 = tpu.matmul %1, %2, %cst {dimension_numbers = #tpu.dot_dimension_numbers<[0], [0], [1], [1], [0, 1, 1, 1], [], []>} : vector<8x8xbf16>, vector<8x128xbf16>, vector<8x128xf32> -> vector<8x128xf32>
    %c0_4 = arith.constant 0 : index
    %c0_5 = arith.constant 0 : index
    %4 = vector.load %arg4[%c0_4, %c0_5] : memref<1x128xf32, #tpu.memory_space<vmem>>, vector<1x128xf32>
    %5 = vector.broadcast %4 : vector<1x128xf32> to vector<8x128xf32>
    %6 = arith.addf %3, %5 : vector<8x128xf32>
    %cst_6 = arith.constant 5.65685415 : f32
    %7 = vector.broadcast %cst_6 : f32 to vector<8x128xf32>
    %8 = arith.mulf %6, %7 : vector<8x128xf32>
    %c0_7 = arith.constant 0 : index
    %c0_8 = arith.constant 0 : index
    %9 = vector.load %arg5[%c0_7, %c0_8] : memref<8x128xf32, #tpu.memory_space<vmem>>, vector<8x128xf32>
    %10 = arith.addf %8, %9 : vector<8x128xf32>
    %c0_9 = arith.constant 0 : index
    %c0_10 = arith.constant 0 : index
    %c0_11 = arith.constant 0 : index
    %11 = vector.load %arg6[%c0_9, %c0_10, %c0_11] : memref<1x8x128xf32, #tpu.memory_space<vmem>>, vector<1x8x128xf32>
    %12 = vector.shape_cast %11 : vector<1x8x128xf32> to vector<8x128xf32>
    %13 = vector.shape_cast %10 : vector<8x128xf32> to vector<1x8x128xf32>
    tpu.vector_store %arg6[%c0_9, %c0_10, %c0_11], %13 {strides = array<i32>} : memref<1x8x128xf32, #tpu.memory_space<vmem>>, vector<1x8x128xf32>,
    return
  }
  func.func @transform_0(%arg0: i32, %arg1: i32) -> (i32, i32, i32) {
    %c0_i32 = arith.constant 0 : i32
    %c0_i32_0 = arith.constant 0 : i32
    return %arg1, %c0_i32, %arg0 : i32, i32, i32
  }
  func.func @transform_1(%arg0: i32, %arg1: i32) -> (i32, i32) {
    %c0_i32 = arith.constant 0 : i32
    %c0_i32_0 = arith.constant 0 : i32
    %c0_i32_1 = arith.constant 0 : i32
    return %c0_i32, %c0_i32_0 : i32, i32
  }
  func.func @transform_2(%arg0: i32, %arg1: i32) -> (i32, i32) {
    %c0_i32 = arith.constant 0 : i32
    %c0_i32_0 = arith.constant 0 : i32
    %c0_i32_1 = arith.constant 0 : i32
    return %c0_i32, %c0_i32_0 : i32, i32
  }
  func.func @transform_3(%arg0: i32, %arg1: i32) -> (i32, i32) {
    %c0_i32 = arith.constant 0 : i32
    %c0_i32_0 = arith.constant 0 : i32
    return %arg0, %c0_i32 : i32, i32
  }
  func.func @transform_4(%arg0: i32, %arg1: i32) -> (i32, i32, i32) {
    %c0_i32 = arith.constant 0 : i32
    %c0_i32_0 = arith.constant 0 : i32
    return %arg1, %arg0, %c0_i32 : i32, i32, i32
  }
}

</mosaic_0001>

<bundles_post_ra>
// kernel: kernel_transformer_pretrain_fwd.1
= control target key start
LH: loop header
LB: loop body
LE: loop exit
PB: predicated region body
PF: predicated region fallthrough
CT: control target
= control target key end

     0   :  { %9 = vsyncpa [#allocation3], 0  ;;  %s667_s0 = inlined_call_operand.vmem [shape: bf16[2,8,8], index: 0, kind: input, shape index: {}]   ;;  %s668_s1 = inlined_call_operand.vmem [shape: bf16[8,128], index: 1, kind: input, shape index: {}]   ;;  %s669_s2 = inlined_call_operand.vmem [shape: f32[1,128], index: 2, kind: input, shape index: {}]   ;;  %s670_s3 = inlined_call_operand.vmem [shape: f32[8,128], index: 3, kind: input, shape index: {}]   ;;  %s671_s4 = inlined_call_operand.hbm [shape: f32[2,8,128], index: 4, kind: output, shape index: {}]  }
   0x1   :  { %11 = vsyncpa [#allocation3 + $0x1], 0  ;;  %s561_s15 = smov 0   ;;  %s563_s16 = smov 0  }
   0x2   :  { %s565_s17 = smov 0   ;;  %s567_s18 = smov 0  }
   0x3   :  { %s569_s19 = smov 0   ;;  %s571_s20 = smov 0  }
   0x4 LB: > { %s386_s21 = sadd.s32 4294967295, %s534_s20   ;;  %s387_s22 = sadd.s32 4294967294, %s534_s20   ;;  %s534_s20 = sphi %s571_s20, %s17_s20   ;;  %s530_s19 = sphi %s569_s19, %s678_s19   ;;  %s526_s18 = sphi %s567_s18, %s677_s18   ;;  %s522_s17 = sphi %s565_s17, %s676_s17   ;;  %s518_s16 = sphi %s563_s16, %s675_s16   ;;  %s514_s15 = sphi %s561_s15, %s674_s15  }
   0x5   : > { %s26_s23 = sadd.s32 1, %s530_s19  ;;  %s134_s24 = sadd.s32 1, %s522_s17 }
   0x6   : > { %p27_p0 = scmp.ge.s32.totalorder %s26_s23, 2  ;;  %p144_p1 = scmp.ne.s32.totalorder %s522_s17, %s518_s16 }
   0x7   : > { %p145_p2 = scmp.eq.s32.totalorder %s386_s21, 1  ;;  %p150_p3 = scmp.ne.s32.totalorder %s518_s16, %s514_s15 }
   0x8   : > { %s680_s23 = smov (%p27_p0, %s26_s23), 0  ;;  %p151_p5 = scmp.eq.s32.totalorder %s387_s22, 1 }
   0x9   : > { %p601_p4 = por %p145_p2, %p144_p1  ;;  %s129_s26 = ssub.s32 %s530_s19, %s680_s23 }
   0xa   : > { %p391_p6 = scmp.ge.s32.totalorder %s534_s20, 1  ;;  %p132_p7 = scmp.eq.s32.totalorder %s129_s26, 0 }
   0xb   : > { %p608_p8 = por %p151_p5, %p150_p3  ;;  %p192_p9 = scmp.lt.s32.totalorder %s534_s20, 3 }
   0xc   : > { %s614_s28 = scalar_select %p132_p7, %s522_s17, %s134_s24  }
   0xd   : > { %p193_p10 = pnand %p391_p6, %p192_p9 }
   0xe   : > { %p224_p11 = scmp.lt.s32.totalorder (!%p193_p10), %s526_s18, 1  ;;  %s221_s10 = sand.u32 (!%p193_p10), 1, %s518_s16  }
   0xf   : > { %196 = sbr.rel (%p193_p10) target bundleno = 334 (0x14e), region = 36  ;;  %s392_s11 = sshll.u32 (!%p193_p10), %s221_s10, 3 }
  0x10   : > { %s396_s12 = sshll.u32 (!%p193_p10), %s526_s18, 3  ;;  %s223_s30 = scalar_lea.vmem (!%p193_p10), [#allocation2], %s392_s11 }
  0x11   : > { %s295_s24 = scalar_lea.hbm (!%p193_p10), %s671_s4, %s396_s12  ;;  %s476_s11 = scalar_lea.hbm (!%p193_p10), %s671_s4, 16 }
  0x14   : > { %v237_v0 = vld [vmem:[%s668_s1] sm:$0xf]  ;;  %vm262_vm0 = vcmask 1043456   ;;  %s225_s5 = scalar_select %p224_p11, %s526_s18, 1  ;;  %vm258_vm1 = vcmask 64512  }
  0x15   : > { %v264_v1 = vsel %vm262_vm0, %v237_v0, 0  ;;  %v455_v4 = vld [vmem:[%s669_s2] ss:$0 sm:$0xff]  ;;  %s284_s18 = scalar_lea.sflag [#allocation3], %s221_s10 }
  0x16   : > { %273 = vmatpush.bf16.msra.mxu0 %v264_v1  ;;  %s393_s6 = sshll.u32 %s225_s5, 2  ;;  %v280_v7 = vld [vmem:[%s670_s3] sm:$0xff]  ;;  %s297_s5 = sshll.u32 %s223_s30, 4  ;;  %s298_s5 = int_to_ptr.vmem [resolvable:$true] %s297_s5 }
  0x17   : > { %s230_s9 = scalar_lea.vmem %s667_s0, %s393_s6  ;;  %s299_s6 = sshll.u32 %s295_s24, 4  ;;  %s300_s6 = int_to_ptr.hbm [resolvable:$true] %s299_s6 }
  0x18   : > { %v236_v2 = vld [vmem:[%s230_s9] sm:$0xf]  ;;  %s470_s7 = sshra.s32 %s300_s6, 4  ;;  %s471_s7 = int_to_ptr.hbm [resolvable:$true] %s470_s7 }
  0x19   : > { %242 = vxpose.xlu0.c.b16.start.end [1/1] (short) (narrow) %v236_v2, 16  ;;  %s472_s8 = scalar_lea.hbm %s471_s7, 8  ;;  %p477_p1 = scmp.lt.s32.totalorder %s471_s7, %s671_s4 }
  0x1a   : > { %p473_p12 = scmp.ne.s32.totalorder %s471_s7, %s472_s8  ;;  %p478_p2 = scmp.lt.s32.totalorder %s476_s11, %s472_s8 }
  0x1c   : > { %p474_p13 = pnand %p473_p12, %p601_p4  ;;  %p479_p3 = por %p478_p2, %p477_p1 }
  0x1e   : > { %p475_p0 = pneg %p474_p13 }
  0x20   : > { %p480_p5 = pnand %p479_p3, %p475_p0 }
  0xc5   : > { %v250_v3 = vpop.trf.xlu0 }
  0xc6   : > { %394 = vmatmul.msk.bf16.vlgmr.msra.gmra.mxu0 %vm258_vm1, %v250_v3 }
 0x143   : > { %v275_v5 = vpop.f32.mrf.mxu0 }
 0x144   : > { %v276_v6 = vadd.f32 %v455_v4, %v275_v5 }
 0x146   : > { %v279_v8 = vmul.f32 5.656854, %v276_v6 }
 0x148   : > { %v281_v9 = vadd.f32 %v280_v7, %v279_v8 }
 0x14a   : > { %282 = vst [vmem:[%s223_s30] sm:$0xff] %v281_v9 }
 0x14b   : > { %v277_v10 = vpop.f32.mrf.mxu0 }
 0x14c   : > { %483 = shalt.err (!%p480_p5)
}
 0x14d   : > { %399 = dma.vmem_to_hbm [thread:$0]  (%p601_p4), %s298_s5, 128, %s300_s6, %s284_s18  }
 0x14e PF: > { %p405_p6 = scmp.ge.s32.totalorder %s534_s20, 2  ;;  %s311_s10 = sand.u32 1, %s514_s15  }
 0x14f   : > { %s312_s21 = scalar_lea.sflag [#allocation3], %s311_s10 }
 0x150   : > { %p402_p7 = pnand %p405_p6, %p608_p8 }
 0x152   : > { %p403_p9 = pneg %p402_p7 }
 0x154   : > { %509 = dma.done.wait (%p403_p9), %s312_s21, 128  }
 0x155   : > { %511 = vsyncadd (%p403_p9), %s312_s21, 4294967168  ;;  %s17_s20 = sadd.s32 1, %s534_s20   ;;  %s674_s15 = smov %s518_s16 }
 0x156   : > { %p14_p10 = scmp.ge.s32.totalorder %s17_s20, 4   ;;  %s675_s16 = smov %s522_s17 }
 0x157   : > { %s676_s17 = smov %s614_s28  ;;  %s677_s18 = smov %s530_s19 }
 0x158   : > { %s678_s19 = smov %s680_s23  ;;  %16 = sbr.rel (!%p14_p10) target bundleno = 4 (0x4), region = 74 }
 0x15d   :  { %318 = vsyncpa [#allocation3], 1 }
 0x15e   :  { %320 = vsyncpa [#allocation3 + $0x1], 1 }

</bundles_post_ra>
